<compile_context>
chip_gen: v7x
topology: tpu7x:2x2x1
jax: 0.10.0
libtpu: 0.0.40
codegen_flags: <defaults>
</compile_context>

<pallas_src>
import functools

import jax
import jax.numpy as jnp
from jax.experimental import pallas as pl
from jax.experimental.pallas import tpu as pltpu

LANE = 128
SUBLANE = 8
HIDDEN = 512
OUT = 3


def _round_up(n, m):
    return (n + m - 1) // m * m


@functools.lru_cache(maxsize=None)
def _vmem_capacity_bytes():
    try:
        return int(pltpu.get_tpu_info().vmem_capacity_bytes)
    except Exception:
        return 64 << 20  # conservative fallback: assume a v7x-sized (64 MiB/TC) part


def _vmem_budget():
    # ~25% headroom for compiler-internal scratch: ~48 MB on v7x, ~96 MB on v5e/v6e.
    return (_vmem_capacity_bytes() * 3) // 4


def _two_tensorcores():
    # Heuristic: 64 MiB-per-core parts (v7x) have 2 TensorCores per chip.
    return _vmem_capacity_bytes() <= (80 << 20)


def _weight_plan(input_dim, w_itemsize, block_k=None):
    """Decide whether w1 stays resident or is K-streamed. Returns (split, block_k, d_pad)."""
    if block_k is not None:  # caller-forced K-split (also used by the test below)
        bk = _round_up(int(block_k), LANE)
        return True, bk, _round_up(input_dim, bk)
    w1_bytes = input_dim * HIDDEN * w_itemsize
    if w1_bytes <= _vmem_budget() // 3:  # leave room for x/out tiles + accumulator
        return False, input_dim, input_dim
    bk = 512  # (512, 512) slab: 0.5 MB (bf16) / 1 MB (f32) per buffer, double-buffered
    return True, bk, _round_up(input_dim, bk)


# ----------------------------------------------------------------------------
# Kernels
# ----------------------------------------------------------------------------
def _action_head_kernel(x_ref, w1_ref, b1_ref, w2_ref, b2_ref, o_ref):
    # x_ref : [TB, D] (f32 or bf16 from HBM; cast in-VMEM to the weight dtype)
    # w1_ref: [D, H]   w2_ref: [H, OP]   (compute dtype; OP = 128, zero-padded)
    # b1_ref: [1, H]   b2_ref: [1, OP]   (f32)
    # o_ref : [TB, OP] f32
    h = jnp.dot(x_ref[...].astype(w1_ref.dtype), w1_ref[...],
                preferred_element_type=jnp.float32)
    h = jnp.maximum(h + b1_ref[...], 0.0)  # bias + ReLU in f32 on the VPU
    y = jnp.dot(h.astype(w2_ref.dtype), w2_ref[...],
                preferred_element_type=jnp.float32) + b2_ref[...]
    o_ref[...] = y.astype(o_ref.dtype)


def _action_head_ksplit_kernel(x_ref, w1_ref, b1_ref, w2_ref, b2_ref, o_ref, acc_ref,
                               *, d_total, block_k):
    # Grid: (batch tiles [parallel], K slabs [arbitrary, last]).
    k = pl.program_id(1)

    @pl.when(k == 0)
    def _():
        acc_ref[...] = jnp.zeros_like(acc_ref)

    xv = x_ref[...]
    if d_total % block_k != 0:
        # Last K slab reads past the true D columns of x (OOB reads are unspecified);
        # w1 rows there are genuine zeros (padded once in prepare_params), but mask x
        # too so stray NaN/Inf garbage can't poison the accumulator.
        col = jax.lax.broadcasted_iota(jnp.int32, xv.shape, 1)
        xv = jnp.where(k * block_k + col < d_total, xv, 0.0)

    acc_ref[...] += jnp.dot(xv.astype(w1_ref.dtype), w1_ref[...],
                            preferred_element_type=jnp.float32)

    @pl.when(k == pl.num_programs(1) - 1)
    def _():
        h = jnp.maximum(acc_ref[...] + b1_ref[...], 0.0)
        y = jnp.dot(h.astype(w2_ref.dtype), w2_ref[...],
                    preferred_element_type=jnp.float32) + b2_ref[...]
        o_ref[...] = y.astype(o_ref.dtype)


# ----------------------------------------------------------------------------
# Param preparation (one-time) and forward wrapper
# ----------------------------------------------------------------------------
def prepare_params(w1, b1, w2, b2, *, compute_dtype=jnp.bfloat16, block_k=None):
    """One-time weight preparation (cast + lane/K padding), hoisted out of the
    steady-state call path.  Weights are [in, out] (transposed vs. torch.nn.Linear).
    Use the same block_k (or None for both) when calling action_head."""
    D, H = w1.shape
    O = w2.shape[1]
    itm = jnp.dtype(compute_dtype).itemsize
    _, _, d_pad = _weight_plan(D, itm, block_k)
    o_pad = _round_up(max(O, LANE), LANE)  # lane-dense output (3 -> 128)

    w1c = w1.astype(compute_dtype)
    if d_pad != D:
        w1c = jnp.pad(w1c, ((0, d_pad - D), (0, 0)))  # zero rows for the K tail
    w2c = jnp.pad(w2.astype(compute_dtype), ((0, 0), (0, o_pad - O)))
    b1f = jnp.reshape(b1, (1, H)).astype(jnp.float32)
    b2f = jnp.pad(jnp.reshape(b2, (1, O)).astype(jnp.float32), ((0, 0), (0, o_pad - O)))
    return w1c, b1f, w2c, b2f


@functools.partial(jax.jit, static_argnames=("block_b", "block_k", "out_dim"))
def action_head(x, w1c, b1f, w2c, b2f, *, block_b=None, block_k=None, out_dim=OUT):
    """Forward pass of ActionHead: relu(x @ w1 + b1) @ w2 + b2 -> [B, out_dim] f32.

    x: [B, D] float32 (or bfloat16 straight from an upstream producer); weights come
    from prepare_params().  block_b / block_k are tuning knobs (None = auto plan).
    """
    B, D = x.shape
    H = w1c.shape[1]
    O_pad = w2c.shape[1]
    itm = jnp.dtype(w1c.dtype).itemsize
    x_itm = jnp.dtype(x.dtype).itemsize

    split, bk, d_pad = _weight_plan(D, itm, block_k)
    assert w1c.shape[0] == d_pad and w2c.shape[0] == H and O_pad % LANE == 0, (
        "weights not prepared for this input_dim / block_k; call prepare_params() "
        "with matching arguments")
    assert b1f.shape == (1, H) and b2f.shape == (1, O_pad)

    budget = _vmem_budget()

    # ---- batch tile ---------------------------------------------------------
    block_b = _round_up(max(SUBLANE, 512 if block_b is None else block_b), SUBLANE)
    block_b = min(block_b, _round_up(B, SUBLANE))
    if _two_tensorcores() and B >= 2 * SUBLANE:
        # Guarantee >= 2 grid steps so both v7x TensorCores get work.
        block_b = min(block_b, _round_up(pl.cdiv(B, 2), SUBLANE))

    xk = bk if split else D
    w1_resident = (2 * bk * H * itm) if split else (d_pad * H * itm)

    def plan_bytes(tb):
        return (2 * tb * xk * x_itm          # x tiles, double-buffered
                + w1_resident                # w1 (resident, or streamed slabs x2)
                + H * 4 + O_pad * 4          # biases
                + H * O_pad * itm            # w2 (resident)
                + 2 * tb * O_pad * 4         # out tiles, double-buffered
                + tb * H * 4)                # f32 hidden / accumulator

    while block_b > SUBLANE and plan_bytes(block_b) > budget:
        block_b = max(SUBLANE, _round_up(block_b // 2, SUBLANE))

    vmem_limit = int(min(max(2 * plan_bytes(block_b) + (4 << 20), 32 << 20), budget))

    resident = dict(pipeline_mode=pl.Buffered(1))  # constant index_map -> single buffer
    nb = pl.cdiv(B, block_b)

    # TODO(synk): for very large B with small D, a narrower (bf16 / 8-lane) output would
    # cut padded-writeback HBM bytes; measure masked-vst cost vs. DMA savings first.
    if not split:
        out = pl.pallas_call(
            _action_head_kernel,
            out_shape=jax.ShapeDtypeStruct((B, O_pad), jnp.float32),
            grid_spec=pl.GridSpec(
                grid=(nb,),
                in_specs=[
                    # TODO(synk): sweep pl.Buffered(3) on the x spec if per-step DMA
                    # latency is exposed for small D.
                    pl.BlockSpec((block_b, D), lambda i: (i, 0)),            # x tile
                    pl.BlockSpec((d_pad, H), lambda i: (0, 0), **resident),  # w1 (whole)
                    pl.BlockSpec((1, H), lambda i: (0, 0), **resident),      # b1
                    pl.BlockSpec((H, O_pad), lambda i: (0, 0), **resident),  # w2 (padded)
                    pl.BlockSpec((1, O_pad), lambda i: (0, 0), **resident),  # b2 (padded)
                ],
                out_specs=pl.BlockSpec((block_b, O_pad), lambda i: (i, 0)),
            ),
            compiler_params=pltpu.CompilerParams(
                dimension_semantics=("parallel",),
                vmem_limit_bytes=vmem_limit,
            ),
        )(x, w1c, b1f, w2c, b2f)
    else:
        nk = d_pad // bk
        kernel = functools.partial(_action_head_ksplit_kernel, d_total=D, block_k=bk)
        out = pl.pallas_call(
            kernel,
            out_shape=jax.ShapeDtypeStruct((B, O_pad), jnp.float32),
            grid_spec=pltpu.PrefetchScalarGridSpec(
                num_scalar_prefetch=0,
                grid=(nb, nk),
                in_specs=[
                    pl.BlockSpec((block_b, bk), lambda i, k: (i, k)),           # x tile
                    pl.BlockSpec((bk, H), lambda i, k: (k, 0)),                 # w1 slab
                    pl.BlockSpec((1, H), lambda i, k: (0, 0), **resident),      # b1
                    pl.BlockSpec((H, O_pad), lambda i, k: (0, 0), **resident),  # w2
                    pl.BlockSpec((1, O_pad), lambda i, k: (0, 0), **resident),  # b2
                ],
                out_specs=pl.BlockSpec((block_b, O_pad), lambda i, k: (i, 0)),
                scratch_shapes=[pltpu.VMEM((block_b, H), jnp.float32)],
            ),
            compiler_params=pltpu.CompilerParams(
                dimension_semantics=("parallel", "arbitrary"),
                vmem_limit_bytes=vmem_limit,
            ),
        )(x, w1c, b1f, w2c, b2f)

    return out[:, :out_dim]


def init_params(key, input_dim, hidden=HIDDEN, out=OUT):
    """torch.nn.Linear-style init (U[-1/sqrt(fan_in), 1/sqrt(fan_in)]), weights [in, out]."""
    k1, k2, k3, k4 = jax.random.split(key, 4)
    bound1 = 1.0 / jnp.sqrt(input_dim)
    bound2 = 1.0 / jnp.sqrt(hidden)
    w1 = jax.random.uniform(k1, (input_dim, hidden), jnp.float32, -bound1, bound1)
    b1 = jax.random.uniform(k2, (1, hidden), jnp.float32, -bound1, bound1)
    w2 = jax.random.uniform(k3, (hidden, out), jnp.float32, -bound2, bound2)
    b2 = jax.random.uniform(k4, (1, out), jnp.float32, -bound2, bound2)
    return w1, b1, w2, b2


if __name__ == "__main__":
    # hidden=512 and out=3 are fixed by ActionHead; small input_dim / batch for the test.
    key = jax.random.PRNGKey(0)
    k_x1, k_p1, k_x2, k_p2 = jax.random.split(key, 4)

    # --- resident-w1 path (default bf16, plus an f32 check) --------------------
    B1, D1 = 6, 256            # B deliberately not a multiple of 8 (ragged batch tile)
    x1 = jax.random.normal(k_x1, (B1, D1), dtype=jnp.float32)
    w1, b1, w2, b2 = init_params(k_p1, D1)
    ref1 = jnp.maximum(x1 @ w1 + b1, 0.0) @ w2 + b2

    params_bf16 = prepare_params(w1, b1, w2, b2)          # bf16 default on all TPU gens
    y_bf16 = jax.block_until_ready(action_head(x1, *params_bf16))
    assert y_bf16.shape == (B1, OUT)
    assert jnp.allclose(y_bf16, ref1, atol=5e-2, rtol=5e-2), "bf16 mismatch vs reference"

    params_f32 = prepare_params(w1, b1, w2, b2, compute_dtype=jnp.float32)
    y_f32 = jax.block_until_ready(action_head(x1, *params_f32))
    assert y_f32.shape == (B1, OUT)
    assert jnp.allclose(y_f32, ref1, atol=1e-4, rtol=1e-4), "f32 mismatch vs reference"

    # --- K-split path (forced small block_k; D not a multiple of block_k) ------
    B2, D2 = 20, 320
    x2 = jax.random.normal(k_x2, (B2, D2), dtype=jnp.float32)
    w1b, b1b, w2b, b2b = init_params(k_p2, D2)
    ref2 = jnp.maximum(x2 @ w1b + b1b, 0.0) @ w2b + b2b

    params_ks = prepare_params(w1b, b1b, w2b, b2b, compute_dtype=jnp.float32, block_k=128)
    y_ks = jax.block_until_ready(action_head(x2, *params_ks, block_k=128))
    assert y_ks.shape == (B2, OUT)
    assert jnp.allclose(y_ks, ref2, atol=1e-3, rtol=1e-3), "K-split mismatch vs reference"

    print("KERNEL_OK")
</pallas_src>

<mosaic_0001>
module attributes {stable_mosaic.version = 11 : i64} {
  func.func @_action_head_kernel(%arg0: i32, %arg1: memref<8x256xf32, #tpu.memory_space<vmem>>, %arg2: memref<256x512xbf16, #tpu.memory_space<vmem>>, %arg3: memref<1x512xf32, #tpu.memory_space<vmem>>, %arg4: memref<512x128xbf16, #tpu.memory_space<vmem>>, %arg5: memref<1x128xf32, #tpu.memory_space<vmem>>, %arg6: memref<8x128xf32, #tpu.memory_space<vmem>>) attributes {dimension_semantics = [#tpu.dimension_semantics<parallel>], iteration_bounds = array<i64: 1>, scalar_prefetch = 0 : i64, scratch_operands = 0 : i64, tpu.core_type = #tpu.core_type<tc>, window_params = [{transform_indices = @transform_0, window_bounds = array<i64: 8, 256>}, {pipeline_mode = #tpu.pipeline_mode<synchronous>, transform_indices = @transform_1, window_bounds = array<i64: 256, 512>}, {pipeline_mode = #tpu.pipeline_mode<synchronous>, transform_indices = @transform_2, window_bounds = array<i64: 1, 512>}, {pipeline_mode = #tpu.pipeline_mode<synchronous>, transform_indices = @transform_3, window_bounds = array<i64: 512, 128>}, {pipeline_mode = #tpu.pipeline_mode<synchronous>, transform_indices = @transform_4, window_bounds = array<i64: 1, 128>}, {transform_indices = @transform_5, window_bounds = array<i64: 8, 128>}]} {
    %c0 = arith.constant 0 : index
    %c0_0 = arith.constant 0 : index
    %0 = vector.load %arg1[%c0, %c0_0] : memref<8x256xf32, #tpu.memory_space<vmem>>, vector<8x256xf32>
    %1 = arith.truncf %0 : vector<8x256xf32> to vector<8x256xbf16>
    %c0_1 = arith.constant 0 : index
    %c0_2 = arith.constant 0 : index
    %2 = vector.load %arg2[%c0_1, %c0_2] : memref<256x512xbf16, #tpu.memory_space<vmem>>, vector<256x512xbf16>
    %cst = arith.constant dense<0.000000e+00> : vector<8x512xf32>
    %3 = tpu.matmul %1, %2, %cst {dimension_numbers = #tpu.dot_dimension_numbers<[1], [0], [0], [1], [0, 0, 1, 1], [], []>} : vector<8x256xbf16>, vector<256x512xbf16>, vector<8x512xf32> -> vector<8x512xf32>
    %c0_3 = arith.constant 0 : index
    %c0_4 = arith.constant 0 : index
    %4 = vector.load %arg3[%c0_3, %c0_4] : memref<1x512xf32, #tpu.memory_space<vmem>>, vector<1x512xf32>
    %5 = vector.broadcast %4 : vector<1x512xf32> to vector<8x512xf32>
    %6 = arith.addf %3, %5 : vector<8x512xf32>
    %cst_5 = arith.constant 0.000000e+00 : f32
    %7 = vector.broadcast %cst_5 : f32 to vector<8x512xf32>
    %8 = arith.maximumf %6, %7 : vector<8x512xf32>
    %9 = arith.truncf %8 : vector<8x512xf32> to vector<8x512xbf16>
    %c0_6 = arith.constant 0 : index
    %c0_7 = arith.constant 0 : index
    %10 = vector.load %arg4[%c0_6, %c0_7] : memref<512x128xbf16, #tpu.memory_space<vmem>>, vector<512x128xbf16>
    %cst_8 = arith.constant dense<0.000000e+00> : vector<8x128xf32>
    %11 = tpu.matmul %9, %10, %cst_8 {dimension_numbers = #tpu.dot_dimension_numbers<[1], [0], [0], [1], [0, 0, 1, 1], [], []>} : vector<8x512xbf16>, vector<512x128xbf16>, vector<8x128xf32> -> vector<8x128xf32>
    %c0_9 = arith.constant 0 : index
    %c0_10 = arith.constant 0 : index
    %12 = vector.load %arg5[%c0_9, %c0_10] : memref<1x128xf32, #tpu.memory_space<vmem>>, vector<1x128xf32>
    %13 = vector.broadcast %12 : vector<1x128xf32> to vector<8x128xf32>
    %14 = arith.addf %11, %13 : vector<8x128xf32>
    %c0_11 = arith.constant 0 : index
    %c0_12 = arith.constant 0 : index
    %15 = vector.load %arg6[%c0_11, %c0_12] : memref<8x128xf32, #tpu.memory_space<vmem>>, vector<8x128xf32>
    tpu.vector_store %arg6[%c0_11, %c0_12], %14 {strides = array<i32>} : memref<8x128xf32, #tpu.memory_space<vmem>>, vector<8x128xf32>,
    return
  }
  func.func @transform_0(%arg0: i32) -> (i32, i32) {
    %c0_i32 = arith.constant 0 : i32
    %c0_i32_0 = arith.constant 0 : i32
    return %arg0, %c0_i32 : i32, i32
  }
  func.func @transform_1(%arg0: i32) -> (i32, i32) {
    %c0_i32 = arith.constant 0 : i32
    %c0_i32_0 = arith.constant 0 : i32
    %c0_i32_1 = arith.constant 0 : i32
    return %c0_i32, %c0_i32_0 : i32, i32
  }
  func.func @transform_2(%arg0: i32) -> (i32, i32) {
    %c0_i32 = arith.constant 0 : i32
    %c0_i32_0 = arith.constant 0 : i32
    %c0_i32_1 = arith.constant 0 : i32
    return %c0_i32, %c0_i32_0 : i32, i32
  }
  func.func @transform_3(%arg0: i32) -> (i32, i32) {
    %c0_i32 = arith.constant 0 : i32
    %c0_i32_0 = arith.constant 0 : i32
    %c0_i32_1 = arith.constant 0 : i32
    return %c0_i32, %c0_i32_0 : i32, i32
  }
  func.func @transform_4(%arg0: i32) -> (i32, i32) {
    %c0_i32 = arith.constant 0 : i32
    %c0_i32_0 = arith.constant 0 : i32
    %c0_i32_1 = arith.constant 0 : i32
    return %c0_i32, %c0_i32_0 : i32, i32
  }
  func.func @transform_5(%arg0: i32) -> (i32, i32) {
    %c0_i32 = arith.constant 0 : i32
    %c0_i32_0 = arith.constant 0 : i32
    return %arg0, %c0_i32 : i32, i32
  }
}

</mosaic_0001>

<bundles_post_ra>
// kernel: action_head.1
= control target key start
LH: loop header
LB: loop body
LE: loop exit
PB: predicated region body
PF: predicated region fallthrough
CT: control target
= control target key end

     0   :  { %10 = vsyncpa [#allocation3], 0  ;;  %s1338_s0 = inlined_call_operand.hbm [shape: f32[6,256], index: 0, kind: input, shape index: {}]   ;;  %s1339_s1 = inlined_call_operand.hbm [shape: bf16[256,512], index: 1, kind: input, shape index: {}]   ;;  %s1340_s2 = inlined_call_operand.vmem [shape: f32[1,512], index: 2, kind: input, shape index: {}]   ;;  %s1341_s3 = inlined_call_operand.hbm [shape: bf16[512,128], index: 3, kind: input, shape index: {}]   ;;  %s1342_s4 = inlined_call_operand.vmem [shape: f32[1,128], index: 4, kind: input, shape index: {}]   ;;  %s1343_s5 = inlined_call_operand.vmem [shape: f32[6,128], index: 5, kind: output, shape index: {}]  }
   0x1   :  { %11 = vsyncpa [#allocation5], 0  ;;  %s1256_s18 = smov [#allocation4]   ;;  %s1186_s22 = scalar_lea.hbm %s1339_s1, 8192 }
   0x2   :  { %s27_s19 = sshll.u32 %s1256_s18, 4  ;;  %p1187_p0 = scmp.ne.s32.totalorder %s1339_s1, %s1186_s22  ;;  %s28_s19 = int_to_ptr.vmem [resolvable:$true] %s27_s19 }
   0x3   :  { %p1190_p1 = scmp.lt.u32.totalorder %s1186_s22, %s1339_s1 }
   0x5   :  { %p1192_p2 = pnand %p1190_p1, %p1187_p0 }
   0x7   :  { %1195 = shalt.err (!%p1192_p2)
}
   0x8   :  { %s1196_s27 = scalar_lea.vmem %s28_s19, 8192  ;;  %p1201_p4 = scmp.lt.s32.totalorder %s28_s19, %s28_s19 }
   0x9   :  { %p1197_p3 = scmp.ne.s32.totalorder %s28_s19, %s1196_s27  ;;  %p1202_p5 = scmp.lt.s32.totalorder %s1196_s27, %s1196_s27 }
   0xb   :  { %p1203_p6 = por %p1202_p5, %p1201_p4 }
   0xd   :  { %p1204_p7 = pnand %p1203_p6, %p1197_p3 }
   0xf   :  { %1207 = shalt.err (!%p1204_p7)
}
  0x10   :  { %s1257_s28 = smov 256   ;;  %s1258_s29 = smov 16  }
  0x11   :  { %33 = dma.hbm_to_vmem [thread:$0]  %s1339_s1, 8192, %s28_s19, [#allocation5], %s1257_s28, %s1257_s28, %s1258_s29  }
  0x12   :  { %s1259_s7 = smov [#allocation2]   ;;  %s1260_s9 = smov [#allocation6]  }
  0x13   :  { %s18_s8 = sshll.u32 %s1259_s7, 4  ;;  %s41_s10 = sshll.u32 %s1260_s9, 4  ;;  %s19_s8 = int_to_ptr.vmem [resolvable:$true] %s18_s8  ;;  %s42_s10 = int_to_ptr.vmem [resolvable:$true] %s41_s10 }
  0x14   :  { %s1208_s13 = scalar_lea.hbm %s1338_s0, 256 }
  0x15   :  { %p1209_p8 = scmp.ne.s32.totalorder %s1338_s0, %s1208_s13  ;;  %p1212_p9 = scmp.lt.u32.totalorder %s1208_s13, %s1338_s0 }
  0x17   :  { %p1214_p10 = pnand %p1212_p9, %p1209_p8 }
  0x19   :  { %1217 = shalt.err (!%p1214_p10)
}
  0x1a   :  { %s1218_s1 = scalar_lea.vmem %s19_s8, 256  ;;  %p1223_p12 = scmp.lt.s32.totalorder %s19_s8, %s19_s8 }
  0x1b   :  { %p1219_p11 = scmp.ne.s32.totalorder %s19_s8, %s1218_s1  ;;  %p1224_p13 = scmp.lt.s32.totalorder %s1218_s1, %s1218_s1 }
  0x1d   :  { %p1225_p0 = por %p1224_p13, %p1223_p12 }
  0x1f   :  { %p1226_p1 = pnand %p1225_p0, %p1219_p11 }
  0x21   :  { %1229 = shalt.err (!%p1226_p1)
}
  0x22   :  { %21 = dma.hbm_to_vmem [thread:$0]  %s1338_s0, 256, %s19_s8, [#allocation3]  }
  0x23   :  { %s1230_s22 = scalar_lea.hbm %s1341_s3, 4096 }
  0x24   :  { %p1231_p2 = scmp.ne.s32.totalorder %s1341_s3, %s1230_s22  ;;  %p1234_p3 = scmp.lt.u32.totalorder %s1230_s22, %s1341_s3 }
  0x26   :  { %p1236_p4 = pnand %p1234_p3, %p1231_p2 }
  0x28   :  { %1239 = shalt.err (!%p1236_p4)
}
  0x29   :  { %s1240_s27 = scalar_lea.vmem %s42_s10, 4096  ;;  %p1245_p6 = scmp.lt.s32.totalorder %s42_s10, %s42_s10 }
  0x2a   :  { %p1241_p5 = scmp.ne.s32.totalorder %s42_s10, %s1240_s27  ;;  %p1246_p7 = scmp.lt.s32.totalorder %s1240_s27, %s1240_s27 }
  0x2c   :  { %p1247_p8 = por %p1246_p7, %p1245_p6 }
  0x2e   :  { %p1248_p9 = pnand %p1247_p8, %p1241_p5 }
  0x30   :  { %1251 = shalt.err (!%p1248_p9)
}
  0x31   :  { %s1261_s0 = smov 64   ;;  %s1262_s28 = smov 4  }
  0x32   :  { %47 = dma.hbm_to_vmem [thread:$0]  %s1341_s3, 4096, %s42_s10, [#allocation5], %s1261_s0, %s1261_s0, %s1262_s28  }
  0x33   :  { %1252 = dma.done.wait [#allocation3], 256  }
  0x34   :  { %1253 = vsyncadd [#allocation3], 4294967040 }
  0x35   :  { %1254 = dma.done.wait [#allocation5], 12288  }
  0x36   :  { %1255 = vsyncadd [#allocation5], 4294955008  ;;  %v1058_v0 = vld [vmem:[#allocation4 + $0x4] ss:$16 sps:$4 sm:$0xff]   ;;  %v1060_v1 = vld [vmem:[#allocation4 + $0xc] ss:$16 sps:$4 sm:$0xff]  }
  0x37   :  { %470 = vmatprep.subr.bf16.mxu0 %v1058_v0  ;;  %v1062_v2 = vld [vmem:[#allocation4] ss:$16 sps:$4 sm:$0xff]   ;;  %v1063_v3 = vld [vmem:[#allocation4 + $0x8] ss:$16 sps:$4 sm:$0xff]   ;;  %511 = vmatprep.subr.bf16.mxu1 %v1060_v1  ;;  %v1064_v4 = vld [vmem:[#allocation4 + $0x24] ss:$16 sps:$4 sm:$0xff]  }
  0x38   :  { %471 = vmatpush1.bf16.msra.mxu0 %v1062_v2  ;;  %512 = vmatpush1.bf16.msra.mxu1 %v1063_v3  ;;  %v1066_v5 = vld [vmem:[#allocation4 + $0x2c] ss:$16 sps:$4 sm:$0xff]   ;;  %v1068_v6 = vld [vmem:[#allocation4 + $0x20] ss:$16 sps:$4 sm:$0xff]   ;;  %v1069_v7 = vld [vmem:[#allocation4 + $0x28] ss:$16 sps:$4 sm:$0xff]  }
  0x39   :  { %472 = vmatprep.subr.bf16.mxu0 %v1064_v4  ;;  %513 = vmatprep.subr.bf16.mxu1 %v1066_v5  ;;  %v1070_v8 = vld [vmem:[#allocation4 + $0x44] ss:$16 sps:$4 sm:$0xff]   ;;  %v1072_v9 = vld [vmem:[#allocation4 + $0x4c] ss:$16 sps:$4 sm:$0xff]   ;;  %v1074_v10 = vld [vmem:[#allocation4 + $0x40] ss:$16 sps:$4 sm:$0xff]  }
  0x3a   :  { %v1075_v11 = vld [vmem:[#allocation4 + $0x48] ss:$16 sps:$4 sm:$0xff]   ;;  %v1076_v12 = vld [vmem:[#allocation4 + $0x64] ss:$16 sps:$4 sm:$0xff]   ;;  %v1078_v13 = vld [vmem:[#allocation4 + $0x6c] ss:$16 sps:$4 sm:$0xff]  }
  0x3b   :  { %v1080_v14 = vld [vmem:[#allocation4 + $0x60] ss:$16 sps:$4 sm:$0xff]   ;;  %v1081_v15 = vld [vmem:[#allocation4 + $0x68] ss:$16 sps:$4 sm:$0xff]   ;;  %v1082_v16 = vld [vmem:[#allocation4 + $0x84] ss:$16 sps:$4 sm:$0xff]  }
  0x3c   :  { %473 = vmatpush1.bf16.msra.mxu0 %v1068_v6  ;;  %514 = vmatpush1.bf16.msra.mxu1 %v1069_v7  ;;  %v1084_v17 = vld [vmem:[#allocation4 + $0x8c] ss:$16 sps:$4 sm:$0xff]   ;;  %v1086_v18 = vld [vmem:[#allocation4 + $0x80] ss:$16 sps:$4 sm:$0xff]   ;;  %v1087_v19 = vld [vmem:[#allocation4 + $0x88] ss:$16 sps:$4 sm:$0xff]  }
  0x3d   :  { %474 = vmatprep.subr.bf16.mxu0 %v1070_v8  ;;  %515 = vmatprep.subr.bf16.mxu1 %v1072_v9  ;;  %v1088_v20 = vld [vmem:[#allocation4 + $0xa4] ss:$16 sps:$4 sm:$0xff]   ;;  %v1090_v21 = vld [vmem:[#allocation4 + $0xac] ss:$16 sps:$4 sm:$0xff]   ;;  %v1092_v22 = vld [vmem:[#allocation4 + $0xa0] ss:$16 sps:$4 sm:$0xff]  }
  0x3e   :  { %v1093_v23 = vld [vmem:[#allocation4 + $0xa8] ss:$16 sps:$4 sm:$0xff]   ;;  %v1094_v24 = vld [vmem:[#allocation4 + $0xc4] ss:$16 sps:$4 sm:$0xff]   ;;  %v1096_v25 = vld [vmem:[#allocation4 + $0xcc] ss:$16 sps:$4 sm:$0xff]  }
  0x3f   :  { %v1098_v26 = vld [vmem:[#allocation4 + $0xc0] ss:$16 sps:$4 sm:$0xff]   ;;  %v1099_v27 = vld [vmem:[#allocation4 + $0xc8] ss:$16 sps:$4 sm:$0xff]   ;;  %v1100_v28 = vld [vmem:[#allocation4 + $0xe4] ss:$16 sps:$4 sm:$0xff]  }
  0x40   :  { %475 = vmatpush1.bf16.msra.mxu0 %v1074_v10  ;;  %516 = vmatpush1.bf16.msra.mxu1 %v1075_v11  ;;  %v1102_v29 = vld [vmem:[#allocation4 + $0xec] ss:$16 sps:$4 sm:$0xff]   ;;  %v1104_v30 = vld [vmem:[#allocation4 + $0xe0] ss:$16 sps:$4 sm:$0xff]   ;;  %v1105_v31 = vld [vmem:[#allocation4 + $0xe8] ss:$16 sps:$4 sm:$0xff]  }
  0x41   :  { %476 = vmatprep.subr.bf16.mxu0 %v1076_v12  ;;  %517 = vmatprep.subr.bf16.mxu1 %v1078_v13  ;;  %v1106_v32 = vld [vmem:[#allocation4 + $0x104] ss:$16 sps:$4 sm:$0xff]   ;;  %v1108_v33 = vld [vmem:[#allocation4 + $0x10c] ss:$16 sps:$4 sm:$0xff]   ;;  %v1110_v34 = vld [vmem:[#allocation4 + $0x100] ss:$16 sps:$4 sm:$0xff]  }
  0x42   :  { %v1111_v35 = vld [vmem:[#allocation4 + $0x108] ss:$16 sps:$4 sm:$0xff]   ;;  %v1112_v36 = vld [vmem:[#allocation4 + $0x124] ss:$16 sps:$4 sm:$0xff]   ;;  %v1114_v37 = vld [vmem:[#allocation4 + $0x12c] ss:$16 sps:$4 sm:$0xff]  }
  0x43   :  { %v1116_v38 = vld [vmem:[#allocation4 + $0x120] ss:$16 sps:$4 sm:$0xff]   ;;  %v1117_v39 = vld [vmem:[#allocation4 + $0x128] ss:$16 sps:$4 sm:$0xff]   ;;  %v1118_v40 = vld [vmem:[#allocation4 + $0x144] ss:$16 sps:$4 sm:$0xff]  }
  0x44   :  { %477 = vmatpush1.bf16.msra.mxu0 %v1080_v14  ;;  %518 = vmatpush1.bf16.msra.mxu1 %v1081_v15  ;;  %v1120_v41 = vld [vmem:[#allocation4 + $0x14c] ss:$16 sps:$4 sm:$0xff]   ;;  %v1122_v42 = vld [vmem:[#allocation4 + $0x140] ss:$16 sps:$4 sm:$0xff]   ;;  %v1123_v43 = vld [vmem:[#allocation4 + $0x148] ss:$16 sps:$4 sm:$0xff]  }
  0x45   :  { %478 = vmatprep.subr.bf16.mxu0 %v1082_v16  ;;  %519 = vmatprep.subr.bf16.mxu1 %v1084_v17  ;;  %v1124_v44 = vld [vmem:[#allocation4 + $0x164] ss:$16 sps:$4 sm:$0xff]   ;;  %v1126_v45 = vld [vmem:[#allocation4 + $0x16c] ss:$16 sps:$4 sm:$0xff]   ;;  %v1128_v46 = vld [vmem:[#allocation4 + $0x160] ss:$16 sps:$4 sm:$0xff]  }
  0x46   :  { %v61_v47 = vld [vmem:[#allocation2 + $0x8] sm:$0xff]  ;;  %v1130_v50 = vld [vmem:[#allocation4 + $0x184] ss:$16 sps:$4 sm:$0xff]   ;;  %v1134_v52 = vld [vmem:[#allocation4 + $0x180] ss:$16 sps:$4 sm:$0xff]  }
  0x47   :  { %v1129_v48 = vld [vmem:[#allocation4 + $0x168] ss:$16 sps:$4 sm:$0xff]   ;;  %v63_v49 = vpack.c.bf16 %v61_v47, %v61_v47  ;;  %v1132_v51 = vld [vmem:[#allocation4 + $0x18c] ss:$16 sps:$4 sm:$0xff]   ;;  %v1136_v54 = vld [vmem:[#allocation4 + $0x1a4] ss:$16 sps:$4 sm:$0xff]  }
  0x48   :  { %479 = vmatpush1.bf16.msra.mxu0 %v1086_v18  ;;  %520 = vmatpush1.bf16.msra.mxu1 %v1087_v19  ;;  %v1135_v53 = vld [vmem:[#allocation4 + $0x188] ss:$16 sps:$4 sm:$0xff]   ;;  %v1138_v55 = vld [vmem:[#allocation4 + $0x1ac] ss:$16 sps:$4 sm:$0xff]   ;;  %v1140_v56 = vld [vmem:[#allocation4 + $0x1a0] ss:$16 sps:$4 sm:$0xff]  }
  0x49   :  { %480 = vmatprep.subr.bf16.mxu0 %v1088_v20  ;;  %521 = vmatprep.subr.bf16.mxu1 %v1090_v21  ;;  %v1141_v57 = vld [vmem:[#allocation4 + $0x1a8] ss:$16 sps:$4 sm:$0xff]   ;;  %v1142_v58 = vld [vmem:[#allocation4 + $0x1c4] ss:$16 sps:$4 sm:$0xff]   ;;  %v1144_v59 = vld [vmem:[#allocation4 + $0x1cc] ss:$16 sps:$4 sm:$0xff]  }
  0x4a   :  { %502 = vmatprep.mubr.bf16.mxu0 %v63_v49  ;;  %543 = vmatprep.mubr.bf16.mxu1 %v63_v49  ;;  %v1146_v60 = vld [vmem:[#allocation4 + $0x1c0] ss:$16 sps:$4 sm:$0xff]   ;;  %v1147_v61 = vld [vmem:[#allocation4 + $0x1c8] ss:$16 sps:$4 sm:$0xff]   ;;  %v1148_v62 = vld [vmem:[#allocation4 + $0x1e4] ss:$16 sps:$4 sm:$0xff]  }
  0x4b   :  { %v1150_v63 = vld [vmem:[#allocation4 + $0x1ec] ss:$16 sps:$4 sm:$0xff]   ;;  %v1152_v0 = vld [vmem:[#allocation4 + $0x1e0] ss:$16 sps:$4 sm:$0xff]   ;;  %v1153_v1 = vld [vmem:[#allocation4 + $0x1e8] ss:$16 sps:$4 sm:$0xff]  }
  0x4c   :  { %481 = vmatpush1.bf16.msra.mxu0 %v1092_v22  ;;  %522 = vmatpush1.bf16.msra.mxu1 %v1093_v23  ;;  %v60_v2 = vld [vmem:[#allocation2] sm:$0xff]  ;;  %v1154_v3 = vld [vmem:[#allocation6 + $0x40] sm:$0xff]   ;;  %v1158_v8 = vld [vmem:[#allocation6 + $0x48] sm:$0xff]  }
  0x4d   :  { %482 = vmatprep.subr.bf16.mxu0 %v1094_v24  ;;  %523 = vmatprep.subr.bf16.mxu1 %v1096_v25  ;;  %v1155_v4 = vld [vmem:[#allocation6 + $0xc0] sm:$0xff]   ;;  %v62_v6 = vpack.c.bf16 %v60_v2, %v60_v2  ;;  %v1159_v9 = vld [vmem:[#allocation6 + $0xc8] sm:$0xff]   ;;  %v1162_v12 = vld [vmem:[#allocation6 + $0x50] sm:$0xff]  }
  0x4e   :  { %v1156_v5 = vld [vmem:[#allocation6] sm:$0xff]   ;;  %v1160_v10 = vld [vmem:[#allocation6 + $0x8] sm:$0xff]   ;;  %v1163_v13 = vld [vmem:[#allocation6 + $0xd0] sm:$0xff]  }
  0x4f   :  { %v1157_v7 = vld [vmem:[#allocation6 + $0x80] sm:$0xff]   ;;  %v1161_v11 = vld [vmem:[#allocation6 + $0x88] sm:$0xff]   ;;  %v1164_v14 = vld [vmem:[#allocation6 + $0x10] sm:$0xff]  }
  0x50   :  { %483 = vmatpush1.bf16.msra.mxu0 %v1098_v26  ;;  %524 = vmatpush1.bf16.msra.mxu1 %v1099_v27  ;;  %v1165_v15 = vld [vmem:[#allocation6 + $0x90] sm:$0xff]   ;;  %v1166_v16 = vld [vmem:[#allocation6 + $0x58] sm:$0xff]   ;;  %v1170_v20 = vld [vmem:[#allocation6 + $0x60] sm:$0xff]  }
  0x51   :  { %484 = vmatprep.subr.bf16.mxu0 %v1100_v28  ;;  %525 = vmatprep.subr.bf16.mxu1 %v1102_v29  ;;  %v1167_v17 = vld [vmem:[#allocation6 + $0xd8] sm:$0xff]   ;;  %v1171_v21 = vld [vmem:[#allocation6 + $0xe0] sm:$0xff]   ;;  %v1174_v24 = vld [vmem:[#allocation6 + $0x68] sm:$0xff]  }
  0x52   :  { %v1168_v18 = vld [vmem:[#allocation6 + $0x18] sm:$0xff]   ;;  %v1172_v22 = vld [vmem:[#allocation6 + $0x20] sm:$0xff]   ;;  %v1175_v25 = vld [vmem:[#allocation6 + $0xe8] sm:$0xff]  }
  0x53   :  { %v1169_v19 = vld [vmem:[#allocation6 + $0x98] sm:$0xff]   ;;  %v1173_v23 = vld [vmem:[#allocation6 + $0xa0] sm:$0xff]   ;;  %v1176_v26 = vld [vmem:[#allocation6 + $0x28] sm:$0xff]  }
  0x54   :  { %485 = vmatpush1.bf16.msra.mxu0 %v1104_v30  ;;  %526 = vmatpush1.bf16.msra.mxu1 %v1105_v31  ;;  %v1177_v27 = vld [vmem:[#allocation6 + $0xa8] sm:$0xff]   ;;  %v1178_v28 = vld [vmem:[#allocation6 + $0x70] sm:$0xff]  }
  0x55   :  { %486 = vmatprep.subr.bf16.mxu0 %v1106_v32  ;;  %527 = vmatprep.subr.bf16.mxu1 %v1108_v33  ;;  %v1179_v29 = vld [vmem:[#allocation6 + $0xf0] sm:$0xff]   ;;  %v1182_v32 = vld [vmem:[#allocation6 + $0x78] sm:$0xff]  }
  0x56   :  { %v1180_v30 = vld [vmem:[#allocation6 + $0x30] sm:$0xff]   ;;  %v1183_v33 = vld [vmem:[#allocation6 + $0xf8] sm:$0xff]  }
  0x57   :  { %v1181_v31 = vld [vmem:[#allocation6 + $0xb0] sm:$0xff]  }
  0x58   :  { %487 = vmatpush1.bf16.msra.mxu0 %v1110_v34  ;;  %528 = vmatpush1.bf16.msra.mxu1 %v1111_v35  ;;  %v1184_v34 = vld [vmem:[#allocation6 + $0x38] sm:$0xff]  }
  0x59   :  { %488 = vmatprep.subr.bf16.mxu0 %v1112_v36  ;;  %529 = vmatprep.subr.bf16.mxu1 %v1114_v37  ;;  %v1185_v35 = vld [vmem:[#allocation6 + $0xb8] sm:$0xff]   ;;  %v130_v36 = vlaneseq }
  0x5b   :  { %v131_v37 = vshrl.u32 %v130_v36, 7 }
  0x5c   :  { %489 = vmatpush1.bf16.msra.mxu0 %v1116_v38  ;;  %530 = vmatpush1.bf16.msra.mxu1 %v1117_v39 }
  0x5d   :  { %490 = vmatprep.subr.bf16.mxu0 %v1118_v40  ;;  %531 = vmatprep.subr.bf16.mxu1 %v1120_v41  ;;  %v132_v38 = vsub.s32 0, %v131_v37  ;;  %v140_v39 = vsub.s32 2, %v131_v37  ;;  %v128_v40 = vld [vmem:[%s1340_s2] sm:$0xf]  ;;  %v136_v41 = vsub.s32 1, %v131_v37 }
  0x60   :  { %491 = vmatpush1.bf16.msra.mxu0 %v1122_v42  ;;  %532 = vmatpush1.bf16.msra.mxu1 %v1123_v43  ;;  %v144_v42 = vsub.s32 3, %v131_v37  ;;  %v133_v43 = vrot.slane %v128_v40, %v132_v38 }
  0x61   :  { %492 = vmatprep.subr.bf16.mxu0 %v1124_v44  ;;  %533 = vmatprep.subr.bf16.mxu1 %v1126_v45  ;;  %v141_v44 = vrot.slane %v128_v40, %v140_v39  ;;  %v137_v45 = vrot.slane %v128_v40, %v136_v41 }
  0x64   :  { %493 = vmatpush1.bf16.msra.mxu0 %v1128_v46  ;;  %534 = vmatpush1.bf16.msra.mxu1 %v1129_v48  ;;  %v145_v46 = vrot.slane %v128_v40, %v144_v42 }
  0x65   :  { %494 = vmatprep.subr.bf16.mxu0 %v1130_v50  ;;  %535 = vmatprep.subr.bf16.mxu1 %v1132_v51 }
  0x68   :  { %495 = vmatpush1.bf16.msra.mxu0 %v1134_v52  ;;  %536 = vmatpush1.bf16.msra.mxu1 %v1135_v53 }
  0x69   :  { %496 = vmatprep.subr.bf16.mxu0 %v1136_v54  ;;  %537 = vmatprep.subr.bf16.mxu1 %v1138_v55 }
  0x6c   :  { %497 = vmatpush1.bf16.msra.mxu0 %v1140_v56  ;;  %538 = vmatpush1.bf16.msra.mxu1 %v1141_v57 }
  0x6d   :  { %498 = vmatprep.subr.bf16.mxu0 %v1142_v58  ;;  %539 = vmatprep.subr.bf16.mxu1 %v1144_v59 }
  0x70   :  { %499 = vmatpush1.bf16.msra.mxu0 %v1146_v60  ;;  %540 = vmatpush1.bf16.msra.mxu1 %v1147_v61 }
  0x71   :  { %500 = vmatprep.subr.bf16.mxu0 %v1148_v62  ;;  %541 = vmatprep.subr.bf16.mxu1 %v1150_v63 }
  0x74   :  { %501 = vmatpush1.bf16.msra.mxu0 %v1152_v0  ;;  %542 = vmatpush1.bf16.msra.mxu1 %v1153_v1 }
  0x75   :  { %1007 = vmatprep.subr.bf16.mxu0 %v1154_v3  ;;  %1029 = vmatprep.subr.bf16.mxu1 %v1155_v4 }
  0x77   :  { %503 = vmatmul.mubr.bf16.vlgmr.msra.gmra.mrb[0].mxu0 %v62_v6  ;;  %544 = vmatmul.mubr.bf16.vlgmr.msra.gmra.mrb[0].mxu1 %v62_v6 }
  0x78   :  { %1008 = vmatpush3.bf16.msra.mxu0 %v1156_v5  ;;  %1030 = vmatpush3.bf16.msra.mxu1 %v1157_v7  ;;  %v974_v5 = vld [vmem:[%s1342_s4] ss:$0 sm:$0xff] }
  0x79   :  { %1009 = vmatprep.subr.bf16.mxu0 %v1158_v8  ;;  %1031 = vmatprep.subr.bf16.mxu1 %v1159_v9 }
  0x7c   :  { %1010 = vmatpush3.bf16.msra.mxu0 %v1160_v10  ;;  %1032 = vmatpush3.bf16.msra.mxu1 %v1161_v11 }
  0x7d   :  { %1011 = vmatprep.subr.bf16.mxu0 %v1162_v12  ;;  %1033 = vmatprep.subr.bf16.mxu1 %v1163_v13 }
  0x80   :  { %1012 = vmatpush3.bf16.msra.mxu0 %v1164_v14  ;;  %1034 = vmatpush3.bf16.msra.mxu1 %v1165_v15 }
  0x81   :  { %1013 = vmatprep.subr.bf16.mxu0 %v1166_v16  ;;  %1035 = vmatprep.subr.bf16.mxu1 %v1167_v17 }
  0x84   :  { %1014 = vmatpush3.bf16.msra.mxu0 %v1168_v18  ;;  %1036 = vmatpush3.bf16.msra.mxu1 %v1169_v19 }
  0x85   :  { %1015 = vmatprep.subr.bf16.mxu0 %v1170_v20  ;;  %1037 = vmatprep.subr.bf16.mxu1 %v1171_v21 }
  0x88   :  { %1016 = vmatpush3.bf16.msra.mxu0 %v1172_v22  ;;  %1038 = vmatpush3.bf16.msra.mxu1 %v1173_v23 }
  0x89   :  { %1017 = vmatprep.subr.bf16.mxu0 %v1174_v24  ;;  %1039 = vmatprep.subr.bf16.mxu1 %v1175_v25 }
  0x8c   :  { %1018 = vmatpush3.bf16.msra.mxu0 %v1176_v26  ;;  %1040 = vmatpush3.bf16.msra.mxu1 %v1177_v27 }
  0x8d   :  { %1019 = vmatprep.subr.bf16.mxu0 %v1178_v28  ;;  %1041 = vmatprep.subr.bf16.mxu1 %v1179_v29 }
  0x90   :  { %1020 = vmatpush3.bf16.msra.mxu0 %v1180_v30  ;;  %1042 = vmatpush3.bf16.msra.mxu1 %v1181_v31 }
  0x91   :  { %1021 = vmatprep.subr.bf16.mxu0 %v1182_v32  ;;  %1043 = vmatprep.subr.bf16.mxu1 %v1183_v33 }
  0x94   :  { %1022 = vmatpush3.bf16.msra.mxu0 %v1184_v34  ;;  %1044 = vmatpush3.bf16.msra.mxu1 %v1185_v35 }
 0x14a   :  { %v504_v47 = vpop.f32.mrb[0].mxu0  ;;  %v545_v48 = vpop.f32.mrb[0].mxu1 }
 0x14b   :  { %v505_v49 = vadd.f32 %v504_v47, %v133_v43  ;;  %v546_v50 = vadd.f32 %v545_v48, %v141_v44  ;;  %v506_v51 = vpop.f32.mrb[1].mxu0  ;;  %v547_v52 = vpop.f32.mrb[1].mxu1 }
 0x14c   :  { %v507_v53 = vadd.f32 %v506_v51, %v137_v45  ;;  %v548_v54 = vadd.f32 %v547_v52, %v145_v46  ;;  %v508_v55 = vpop.f32.mrb[2].mxu0  ;;  %v549_v56 = vpop.f32.mrb[2].mxu1 }
 0x14d   :  { %v552_v57 = vmax.f32 %v505_v49, 0.0  ;;  %v554_v58 = vmax.f32 %v546_v50, 0.0  ;;  %v509_v59 = vpop.f32.mrb[3].mxu0  ;;  %v550_v60 = vpop.f32.mrb[3].mxu1 }
 0x14e   :  { %v553_v61 = vmax.f32 %v507_v53, 0.0  ;;  %v555_v62 = vmax.f32 %v548_v54, 0.0 }
 0x14f   :  { %v558_v63 = vpack.c.bf16 %v554_v58, %v554_v58  ;;  %v556_v2 = vpack.c.bf16 %v552_v57, %v552_v57 }
 0x150   :  { %v557_v0 = vpack.c.bf16 %v553_v61, %v553_v61  ;;  %v559_v1 = vpack.c.bf16 %v555_v62, %v555_v62 }
 0x152   :  { %855 = vmatprep.mubr.bf16.mxu0 %v557_v0  ;;  %895 = vmatprep.mubr.bf16.mxu1 %v559_v1 }
 0x153   :  { %856 = vmatmul.mubr.bf16.vlgmr.msra.gmra.mrb[4].mxu0 %v556_v2  ;;  %896 = vmatmul.mubr.bf16.vlgmr.msra.gmra.mrb[4].mxu1 %v558_v63 }
 0x226   :  { %v1023_v3 = vpop.f32.mrb[4].mxu0  ;;  %v1045_v4 = vpop.f32.mrb[4].mxu1 }
 0x227   :  { %v1024_v6 = vpop.f32.mrb[5].mxu0  ;;  %v1046_v7 = vpop.f32.mrb[5].mxu1 }
 0x228   :  { %v1025_v8 = vadd.f32 %v1024_v6, %v1023_v3  ;;  %v1047_v9 = vadd.f32 %v1046_v7, %v1045_v4  ;;  %v1026_v10 = vpop.f32.mrb[6].mxu0  ;;  %v1048_v11 = vpop.f32.mrb[6].mxu1 }
 0x229   :  { %v1027_v12 = vpop.f32.mrb[7].mxu0  ;;  %v1049_v13 = vpop.f32.mrb[7].mxu1 }
 0x22a   :  { %v858_v14 = vadd.f32 %v1025_v8, %v974_v5 }
 0x22c   :  { %v898_v15 = vadd.f32 %v1047_v9, %v858_v14 }
 0x22e   :  { %903 = vst [vmem:[%s1343_s5] sm:$0xff] %v898_v15 }
 0x22f   :  { %908 = vsyncpa [#allocation3], 1 }
 0x230   :  { %909 = vsyncpa [#allocation5], 1 }

</bundles_post_ra>
